<compile_context>
chip_gen: v7x
topology: tpu7x:2x2x1
jax: 0.10.0
libtpu: 0.0.40
codegen_flags: <defaults>
</compile_context>

<pallas_src>
import jax
import jax.numpy as jnp
from jax.experimental import pallas as pl
from jax.experimental.pallas import tpu as pltpu


def spatial_attention_kernel(xa_ref, w1_ref, b1_ref, w2_ref, b2_ref, out_ref, attn_ref):
    # xa_ref block:  (BB, N, H)  -- full key rows for BB batch elements.
    # out_ref block: (BB, TI, H); attn_ref block: (BB, TI, N) -- one query tile.
    BB, N, H = xa_ref.shape
    TI = out_ref.shape[1]

    x = xa_ref[...]                                        # (BB, N, H)
    w1 = w1_ref[...]                                       # (H, 2H) = [W1a^T | W1b^T]
    b1 = b1_ref[...]                                       # (1, H)
    w2 = w2_ref[...].reshape(1, 1, H)                      # hoisted broadcast operand
    b2 = b2_ref[0, 0]

    # Single fused MXU call: columns [:H] are the "query" half (x @ W1a^T),
    # columns [H:] the "key" half (x @ W1b^T) of the pairwise Linear(2H -> H).
    ab = jnp.dot(x.reshape(BB * N, H), w1,
                 preferred_element_type=jnp.float32).reshape(BB, N, 2 * H)

    if TI == N:
        ab_q = ab                                          # query tile == all rows
    else:
        start = pl.multiple_of(pl.program_id(1) * TI, TI)
        x_q = xa_ref[:, pl.ds(start, TI), :]               # (BB, TI, H) query rows
        ab_q = jnp.dot(x_q.reshape(BB * TI, H), w1,
                       preferred_element_type=jnp.float32).reshape(BB, TI, 2 * H)

    for bb in range(BB):                                   # static unroll; BB is small
        a_i = ab_q[bb][:, :H] + b1                         # (TI, H); bias hoisted out of N^2
        b_j = ab[bb][:, H:]                                # (N, H)

        # hidden[i, j, :] = relu(a_i[i] + b_j[j]) -- only a (TI, N, H) tile lives at once.
        hidden = jnp.maximum(a_i[:, None, :] + b_j[None, :, :], 0.0)   # (TI, N, H)
        logits = jnp.sum(hidden * w2, axis=-1) + b2                    # (TI, N)

        # Row softmax over j.
        m = jnp.max(logits, axis=-1, keepdims=True)
        e = jnp.exp(logits - m)
        denom = jnp.sum(e, axis=-1, keepdims=True)
        # Exact reciprocal keeps the 1e-4 parity with the f32 reference
        # (approx=True would move it fully to the EUP at ~1e-3 rel error).
        attn = e * pl.reciprocal(denom, approx=False)                  # (TI, N)

        attn_ref[bb] = attn.astype(attn_ref.dtype)
        out_ref[bb] = jnp.dot(attn, x[bb],
                              preferred_element_type=jnp.float32).astype(out_ref.dtype)


def spatial_attention(x, w1, b1, w2, b2, *, hidden_budget_bytes=8 << 20):
    """x: (B, N, H); w1: (H, 2H); b1: (H,); w2: (1, H); b2: (1,)."""
    B, N, H = x.shape
    f32 = jnp.float32
    bytes_per = 4

    # [W1a^T | W1b^T] so one MXU call covers both halves of the concat-linear.
    w1_fused = jnp.concatenate([w1[:, :H].T, w1[:, H:].T], axis=1).astype(f32)  # (H, 2H)
    b1_2d = b1.reshape(1, H).astype(f32)
    w2_2d = w2.reshape(1, H).astype(f32)
    b2_2d = b2.reshape(1, 1).astype(f32)

    # Tile selection: keep the (TI, N, H) pairwise transient within a budget that
    # is safe on v7x's 64 MiB VMEM; collapse the whole batch into a single grid
    # step when it is small enough (per-grid-step overhead dominates tiny shapes).
    if B * N * N * H * bytes_per <= hidden_budget_bytes:
        BB, TI = B, N                       # one grid step for the whole problem
    elif N * N * H * bytes_per <= hidden_budget_bytes:
        BB, TI = 1, N                       # one batch element per step, full rows
    else:
        BB = 1                              # tile over query rows
        max_ti = max(8, hidden_budget_bytes // (N * H * bytes_per))
        TI = N
        for cand in range(min(max_ti, N), 7, -1):
            if cand % 8 == 0 and N % cand == 0:
                TI = cand
                break

    num_b = B // BB
    num_i = N // TI

    # Explicit VMEM budget: double-buffered I/O blocks + (double-buffered) weights
    # + in-kernel transients (hidden tile, fused matmul result, logits/softmax).
    est = (2 * BB * (N * H + TI * H + TI * N) * bytes_per
           + 2 * (2 * H * H + 2 * H + 1) * bytes_per
           + BB * (TI * N * H + 4 * N * H + 4 * TI * N) * bytes_per)
    vmem_limit = int(min(max(2 * est, 16 << 20), 48 << 20))

    out, attn = pl.pallas_call(
        spatial_attention_kernel,
        out_shape=(jax.ShapeDtypeStruct((B, N, H), x.dtype),
                   jax.ShapeDtypeStruct((B, N, N), x.dtype)),
        grid_spec=pltpu.PrefetchScalarGridSpec(
            num_scalar_prefetch=0,
            grid=(num_b, num_i),
            in_specs=[
                pl.BlockSpec((BB, N, H), lambda b, i: (b, 0, 0)),     # x (all key rows)
                pl.BlockSpec((H, 2 * H), lambda b, i: (0, 0)),        # [W1a^T | W1b^T]
                pl.BlockSpec((1, H), lambda b, i: (0, 0)),            # b1
                pl.BlockSpec((1, H), lambda b, i: (0, 0)),            # w2 row
                pl.BlockSpec((1, 1), lambda b, i: (0, 0)),            # b2
            ],
            out_specs=[
                pl.BlockSpec((BB, TI, H), lambda b, i: (b, i, 0)),    # updated features
                pl.BlockSpec((BB, TI, N), lambda b, i: (b, i, 0)),    # attention rows
            ],
        ),
        compiler_params=pltpu.CompilerParams(
            dimension_semantics=("parallel", "parallel"),
            vmem_limit_bytes=vmem_limit),
    )(x.astype(f32), w1_fused, b1_2d, w2_2d, b2_2d)
    return out, attn


def reference(x, w1, b1, w2, b2):
    B, N, H = x.shape
    ni = jnp.broadcast_to(x[:, :, None, :], (B, N, N, H))
    nj = jnp.broadcast_to(x[:, None, :, :], (B, N, N, H))
    pairs = jnp.concatenate([ni, nj], axis=-1)                    # (B, N, N, 2H)
    h = jnp.maximum(pairs @ w1.T + b1, 0.0)                       # (B, N, N, H)
    logits = (h @ w2.T + b2)[..., 0]                              # (B, N, N)
    attn = jax.nn.softmax(logits, axis=-1)
    return attn @ x, attn


if __name__ == "__main__":
    B, N, H = 2, 8, 32

    key = jax.random.PRNGKey(0)
    kx, kw1, kb1, kw2, kb2 = jax.random.split(key, 5)

    x = jax.random.normal(kx, (B, N, H), dtype=jnp.float32)

    # Deterministic init mimicking nn.Linear defaults (U(-1/sqrt(fan_in), 1/sqrt(fan_in))).
    bound1 = 1.0 / jnp.sqrt(2.0 * H)
    w1 = jax.random.uniform(kw1, (H, 2 * H), jnp.float32, -bound1, bound1)
    b1 = jax.random.uniform(kb1, (H,), jnp.float32, -bound1, bound1)
    bound2 = 1.0 / jnp.sqrt(1.0 * H)
    w2 = jax.random.uniform(kw2, (1, H), jnp.float32, -bound2, bound2)
    b2 = jax.random.uniform(kb2, (1,), jnp.float32, -bound2, bound2)

    out, attn = spatial_attention(x, w1, b1, w2, b2)
    out, attn = jax.block_until_ready((out, attn))

    ref_out, ref_attn = reference(x, w1, b1, w2, b2)
    assert jnp.allclose(out, ref_out, atol=1e-4, rtol=1e-4)
    assert jnp.allclose(attn, ref_attn, atol=1e-4, rtol=1e-4)

    print("KERNEL_OK")
</pallas_src>

<mosaic_0001>
module attributes {stable_mosaic.version = 11 : i64} {
  func.func @spatial_attention_kernel(%arg0: i32, %arg1: i32, %arg2: memref<2x8x32xf32, #tpu.memory_space<vmem>>, %arg3: memref<32x64xf32, #tpu.memory_space<vmem>>, %arg4: memref<1x32xf32, #tpu.memory_space<vmem>>, %arg5: memref<1x32xf32, #tpu.memory_space<vmem>>, %arg6: memref<1x1xf32, #tpu.memory_space<vmem>>, %arg7: memref<2x8x32xf32, #tpu.memory_space<vmem>>, %arg8: memref<2x8x8xf32, #tpu.memory_space<vmem>>) attributes {dimension_semantics = [#tpu.dimension_semantics<parallel>, #tpu.dimension_semantics<parallel>], iteration_bounds = array<i64: 1, 1>, scalar_prefetch = 0 : i64, scratch_operands = 0 : i64, tpu.core_type = #tpu.core_type<tc>, window_params = [{transform_indices = @transform_0, window_bounds = array<i64: 2, 8, 32>}, {pipeline_mode = #tpu.pipeline_mode<synchronous>, transform_indices = @transform_1, window_bounds = array<i64: 32, 64>}, {pipeline_mode = #tpu.pipeline_mode<synchronous>, transform_indices = @transform_2, window_bounds = array<i64: 1, 32>}, {pipeline_mode = #tpu.pipeline_mode<synchronous>, transform_indices = @transform_3, window_bounds = array<i64: 1, 32>}, {pipeline_mode = #tpu.pipeline_mode<synchronous>, transform_indices = @transform_4, window_bounds = array<i64: 1, 1>}, {transform_indices = @transform_5, window_bounds = array<i64: 2, 8, 32>}, {transform_indices = @transform_6, window_bounds = array<i64: 2, 8, 8>}]} {
    %c0 = arith.constant 0 : index
    %c0_0 = arith.constant 0 : index
    %c0_1 = arith.constant 0 : index
    %0 = vector.load %arg2[%c0, %c0_0, %c0_1] : memref<2x8x32xf32, #tpu.memory_space<vmem>>, vector<2x8x32xf32>
    %c0_2 = arith.constant 0 : index
    %c0_3 = arith.constant 0 : index
    %1 = vector.load %arg3[%c0_2, %c0_3] : memref<32x64xf32, #tpu.memory_space<vmem>>, vector<32x64xf32>
    %c0_4 = arith.constant 0 : index
    %c0_5 = arith.constant 0 : index
    %2 = vector.load %arg4[%c0_4, %c0_5] : memref<1x32xf32, #tpu.memory_space<vmem>>, vector<1x32xf32>
    %c0_6 = arith.constant 0 : index
    %c0_7 = arith.constant 0 : index
    %3 = vector.load %arg5[%c0_6, %c0_7] : memref<1x32xf32, #tpu.memory_space<vmem>>, vector<1x32xf32>
    %4 = vector.shape_cast %3 : vector<1x32xf32> to vector<1x1x32xf32>
    %c0_8 = arith.constant 0 : index
    %c0_9 = arith.constant 0 : index
    %5 = vector.load %arg6[%c0_8, %c0_9] : memref<1x1xf32, #tpu.memory_space<vmem>>, vector<1x1xf32>
    %6 = vector.extract %5[0, 0] : f32 from vector<1x1xf32>
    %7 = vector.shape_cast %0 : vector<2x8x32xf32> to vector<16x32xf32>
    %cst = arith.constant dense<0.000000e+00> : vector<16x64xf32>
    %8 = tpu.matmul %7, %1, %cst {dimension_numbers = #tpu.dot_dimension_numbers<[1], [0], [0], [1], [0, 0, 1, 1], [], []>} : vector<16x32xf32>, vector<32x64xf32>, vector<16x64xf32> -> vector<16x64xf32>
    %9 = vector.shape_cast %8 : vector<16x64xf32> to vector<2x8x64xf32>
    %10 = vector.extract_strided_slice %9 {offsets = [0, 0, 0], sizes = [1, 8, 64], strides = [1, 1, 1]} : vector<2x8x64xf32> to vector<1x8x64xf32>
    %11 = vector.shape_cast %10 : vector<1x8x64xf32> to vector<8x64xf32>
    %12 = vector.extract_strided_slice %11 {offsets = [0, 0], sizes = [8, 32], strides = [1, 1]} : vector<8x64xf32> to vector<8x32xf32>
    %13 = vector.broadcast %2 : vector<1x32xf32> to vector<8x32xf32>
    %14 = arith.addf %12, %13 : vector<8x32xf32>
    %15 = vector.extract_strided_slice %9 {offsets = [0, 0, 0], sizes = [1, 8, 64], strides = [1, 1, 1]} : vector<2x8x64xf32> to vector<1x8x64xf32>
    %16 = vector.shape_cast %15 : vector<1x8x64xf32> to vector<8x64xf32>
    %17 = vector.extract_strided_slice %16 {offsets = [0, 32], sizes = [8, 32], strides = [1, 1]} : vector<8x64xf32> to vector<8x32xf32>
    %18 = vector.shape_cast %14 : vector<8x32xf32> to vector<8x1x32xf32>
    %19 = vector.shape_cast %17 : vector<8x32xf32> to vector<1x8x32xf32>
    %20 = vector.broadcast %18 : vector<8x1x32xf32> to vector<8x8x32xf32>
    %21 = vector.broadcast %19 : vector<1x8x32xf32> to vector<8x8x32xf32>
    %22 = arith.addf %20, %21 : vector<8x8x32xf32>
    %cst_10 = arith.constant 0.000000e+00 : f32
    %23 = vector.broadcast %cst_10 : f32 to vector<8x8x32xf32>
    %24 = arith.maximumf %22, %23 : vector<8x8x32xf32>
    %25 = vector.broadcast %4 : vector<1x1x32xf32> to vector<8x8x32xf32>
    %26 = arith.mulf %24, %25 : vector<8x8x32xf32>
    %cst_11 = arith.constant dense<0.000000e+00> : vector<8x8xf32>
    %27 = vector.multi_reduction <add>, %26, %cst_11 [2] : vector<8x8x32xf32> to vector<8x8xf32>
    %28 = vector.broadcast %6 : f32 to vector<8x8xf32>
    %29 = arith.addf %27, %28 : vector<8x8xf32>
    %cst_12 = arith.constant dense<0xFF800000> : vector<8xf32>
    %30 = vector.multi_reduction <maximumf>, %29, %cst_12 [1] : vector<8x8xf32> to vector<8xf32>
    %31 = vector.shape_cast %30 : vector<8xf32> to vector<8x1xf32>
    %32 = vector.broadcast %31 : vector<8x1xf32> to vector<8x8xf32>
    %33 = arith.subf %29, %32 : vector<8x8xf32>
    %34 = math.exp %33 : vector<8x8xf32>
    %cst_13 = arith.constant dense<0.000000e+00> : vector<8xf32>
    %35 = vector.multi_reduction <add>, %34, %cst_13 [1] : vector<8x8xf32> to vector<8xf32>
    %36 = vector.shape_cast %35 : vector<8xf32> to vector<8x1xf32>
    %37 = tpu.reciprocal %36 : vector<8x1xf32> -> vector<8x1xf32>
    %38 = vector.broadcast %37 : vector<8x1xf32> to vector<8x8xf32>
    %39 = arith.mulf %34, %38 : vector<8x8xf32>
    %c0_14 = arith.constant 0 : index
    %c0_15 = arith.constant 0 : index
    %c0_16 = arith.constant 0 : index
    %40 = vector.load %arg8[%c0_14, %c0_15, %c0_16] : memref<2x8x8xf32, #tpu.memory_space<vmem>>, vector<1x8x8xf32>
    %41 = vector.shape_cast %40 : vector<1x8x8xf32> to vector<8x8xf32>
    %42 = vector.shape_cast %39 : vector<8x8xf32> to vector<1x8x8xf32>
    tpu.vector_store %arg8[%c0_14, %c0_15, %c0_16], %42 {strides = array<i32>} : memref<2x8x8xf32, #tpu.memory_space<vmem>>, vector<1x8x8xf32>,
    %43 = vector.extract_strided_slice %0 {offsets = [0, 0, 0], sizes = [1, 8, 32], strides = [1, 1, 1]} : vector<2x8x32xf32> to vector<1x8x32xf32>
    %44 = vector.shape_cast %43 : vector<1x8x32xf32> to vector<8x32xf32>
    %cst_17 = arith.constant dense<0.000000e+00> : vector<8x32xf32>
    %45 = tpu.matmul %39, %44, %cst_17 {dimension_numbers = #tpu.dot_dimension_numbers<[1], [0], [0], [1], [0, 0, 1, 1], [], []>} : vector<8x8xf32>, vector<8x32xf32>, vector<8x32xf32> -> vector<8x32xf32>
    %c0_18 = arith.constant 0 : index
    %c0_19 = arith.constant 0 : index
    %c0_20 = arith.constant 0 : index
    %46 = vector.load %arg7[%c0_18, %c0_19, %c0_20] : memref<2x8x32xf32, #tpu.memory_space<vmem>>, vector<1x8x32xf32>
    %47 = vector.shape_cast %46 : vector<1x8x32xf32> to vector<8x32xf32>
    %48 = vector.shape_cast %45 : vector<8x32xf32> to vector<1x8x32xf32>
    tpu.vector_store %arg7[%c0_18, %c0_19, %c0_20], %48 {strides = array<i32>} : memref<2x8x32xf32, #tpu.memory_space<vmem>>, vector<1x8x32xf32>,
    %49 = vector.extract_strided_slice %9 {offsets = [1, 0, 0], sizes = [1, 8, 64], strides = [1, 1, 1]} : vector<2x8x64xf32> to vector<1x8x64xf32>
    %50 = vector.shape_cast %49 : vector<1x8x64xf32> to vector<8x64xf32>
    %51 = vector.extract_strided_slice %50 {offsets = [0, 0], sizes = [8, 32], strides = [1, 1]} : vector<8x64xf32> to vector<8x32xf32>
    %52 = vector.broadcast %2 : vector<1x32xf32> to vector<8x32xf32>
    %53 = arith.addf %51, %52 : vector<8x32xf32>
    %54 = vector.extract_strided_slice %9 {offsets = [1, 0, 0], sizes = [1, 8, 64], strides = [1, 1, 1]} : vector<2x8x64xf32> to vector<1x8x64xf32>
    %55 = vector.shape_cast %54 : vector<1x8x64xf32> to vector<8x64xf32>
    %56 = vector.extract_strided_slice %55 {offsets = [0, 32], sizes = [8, 32], strides = [1, 1]} : vector<8x64xf32> to vector<8x32xf32>
    %57 = vector.shape_cast %53 : vector<8x32xf32> to vector<8x1x32xf32>
    %58 = vector.shape_cast %56 : vector<8x32xf32> to vector<1x8x32xf32>
    %59 = vector.broadcast %57 : vector<8x1x32xf32> to vector<8x8x32xf32>
    %60 = vector.broadcast %58 : vector<1x8x32xf32> to vector<8x8x32xf32>
    %61 = arith.addf %59, %60 : vector<8x8x32xf32>
    %cst_21 = arith.constant 0.000000e+00 : f32
    %62 = vector.broadcast %cst_21 : f32 to vector<8x8x32xf32>
    %63 = arith.maximumf %61, %62 : vector<8x8x32xf32>
    %64 = vector.broadcast %4 : vector<1x1x32xf32> to vector<8x8x32xf32>
    %65 = arith.mulf %63, %64 : vector<8x8x32xf32>
    %cst_22 = arith.constant dense<0.000000e+00> : vector<8x8xf32>
    %66 = vector.multi_reduction <add>, %65, %cst_22 [2] : vector<8x8x32xf32> to vector<8x8xf32>
    %67 = vector.broadcast %6 : f32 to vector<8x8xf32>
    %68 = arith.addf %66, %67 : vector<8x8xf32>
    %cst_23 = arith.constant dense<0xFF800000> : vector<8xf32>
    %69 = vector.multi_reduction <maximumf>, %68, %cst_23 [1] : vector<8x8xf32> to vector<8xf32>
    %70 = vector.shape_cast %69 : vector<8xf32> to vector<8x1xf32>
    %71 = vector.broadcast %70 : vector<8x1xf32> to vector<8x8xf32>
    %72 = arith.subf %68, %71 : vector<8x8xf32>
    %73 = math.exp %72 : vector<8x8xf32>
    %cst_24 = arith.constant dense<0.000000e+00> : vector<8xf32>
    %74 = vector.multi_reduction <add>, %73, %cst_24 [1] : vector<8x8xf32> to vector<8xf32>
    %75 = vector.shape_cast %74 : vector<8xf32> to vector<8x1xf32>
    %76 = tpu.reciprocal %75 : vector<8x1xf32> -> vector<8x1xf32>
    %77 = vector.broadcast %76 : vector<8x1xf32> to vector<8x8xf32>
    %78 = arith.mulf %73, %77 : vector<8x8xf32>
    %c1 = arith.constant 1 : index
    %c0_25 = arith.constant 0 : index
    %c0_26 = arith.constant 0 : index
    %79 = vector.load %arg8[%c1, %c0_25, %c0_26] : memref<2x8x8xf32, #tpu.memory_space<vmem>>, vector<1x8x8xf32>
    %80 = vector.shape_cast %79 : vector<1x8x8xf32> to vector<8x8xf32>
    %81 = vector.shape_cast %78 : vector<8x8xf32> to vector<1x8x8xf32>
    tpu.vector_store %arg8[%c1, %c0_25, %c0_26], %81 {strides = array<i32>} : memref<2x8x8xf32, #tpu.memory_space<vmem>>, vector<1x8x8xf32>,
    %82 = vector.extract_strided_slice %0 {offsets = [1, 0, 0], sizes = [1, 8, 32], strides = [1, 1, 1]} : vector<2x8x32xf32> to vector<1x8x32xf32>
    %83 = vector.shape_cast %82 : vector<1x8x32xf32> to vector<8x32xf32>
    %cst_27 = arith.constant dense<0.000000e+00> : vector<8x32xf32>
    %84 = tpu.matmul %78, %83, %cst_27 {dimension_numbers = #tpu.dot_dimension_numbers<[1], [0], [0], [1], [0, 0, 1, 1], [], []>} : vector<8x8xf32>, vector<8x32xf32>, vector<8x32xf32> -> vector<8x32xf32>
    %c1_28 = arith.constant 1 : index
    %c0_29 = arith.constant 0 : index
    %c0_30 = arith.constant 0 : index
    %85 = vector.load %arg7[%c1_28, %c0_29, %c0_30] : memref<2x8x32xf32, #tpu.memory_space<vmem>>, vector<1x8x32xf32>
    %86 = vector.shape_cast %85 : vector<1x8x32xf32> to vector<8x32xf32>
    %87 = vector.shape_cast %84 : vector<8x32xf32> to vector<1x8x32xf32>
    tpu.vector_store %arg7[%c1_28, %c0_29, %c0_30], %87 {strides = array<i32>} : memref<2x8x32xf32, #tpu.memory_space<vmem>>, vector<1x8x32xf32>,
    return
  }
  func.func @transform_0(%arg0: i32, %arg1: i32) -> (i32, i32, i32) {
    %c0_i32 = arith.constant 0 : i32
    %c0_i32_0 = arith.constant 0 : i32
    %c0_i32_1 = arith.constant 0 : i32
    return %arg0, %c0_i32, %c0_i32_0 : i32, i32, i32
  }
  func.func @transform_1(%arg0: i32, %arg1: i32) -> (i32, i32) {
    %c0_i32 = arith.constant 0 : i32
    %c0_i32_0 = arith.constant 0 : i32
    %c0_i32_1 = arith.constant 0 : i32
    return %c0_i32, %c0_i32_0 : i32, i32
  }
  func.func @transform_2(%arg0: i32, %arg1: i32) -> (i32, i32) {
    %c0_i32 = arith.constant 0 : i32
    %c0_i32_0 = arith.constant 0 : i32
    %c0_i32_1 = arith.constant 0 : i32
    return %c0_i32, %c0_i32_0 : i32, i32
  }
  func.func @transform_3(%arg0: i32, %arg1: i32) -> (i32, i32) {
    %c0_i32 = arith.constant 0 : i32
    %c0_i32_0 = arith.constant 0 : i32
    %c0_i32_1 = arith.constant 0 : i32
    return %c0_i32, %c0_i32_0 : i32, i32
  }
  func.func @transform_4(%arg0: i32, %arg1: i32) -> (i32, i32) {
    %c0_i32 = arith.constant 0 : i32
    %c0_i32_0 = arith.constant 0 : i32
    %c0_i32_1 = arith.constant 0 : i32
    return %c0_i32, %c0_i32_0 : i32, i32
  }
  func.func @transform_5(%arg0: i32, %arg1: i32) -> (i32, i32, i32) {
    %c0_i32 = arith.constant 0 : i32
    %c0_i32_0 = arith.constant 0 : i32
    return %arg0, %arg1, %c0_i32 : i32, i32, i32
  }
  func.func @transform_6(%arg0: i32, %arg1: i32) -> (i32, i32, i32) {
    %c0_i32 = arith.constant 0 : i32
    %c0_i32_0 = arith.constant 0 : i32
    return %arg0, %arg1, %c0_i32 : i32, i32, i32
  }
}

</mosaic_0001>

<bundles_post_ra>
// kernel: tpu_custom_call.1
= control target key start
LH: loop header
LB: loop body
LE: loop exit
PB: predicated region body
PF: predicated region fallthrough
CT: control target
= control target key end

     0   :  { %s1993_s0 = inlined_call_operand.hbm [shape: f32[2,8,32], index: 0, kind: input, shape index: {}]   ;;  %s1994_s1 = inlined_call_operand.hbm [shape: f32[32,64], index: 1, kind: input, shape index: {}]   ;;  %s1995_s2 = inlined_call_operand.vmem [shape: f32[1,32], index: 2, kind: input, shape index: {}]   ;;  %s1996_s3 = inlined_call_operand.vmem [shape: f32[1,32], index: 3, kind: input, shape index: {}]   ;;  %s1997_s4 = inlined_call_operand.<no memory space> [shape: f32[1,1], index: 4, kind: input, shape index: {}]   ;;  %s1998_s5 = inlined_call_operand.hbm [shape: f32[2,8,32], index: 5, kind: output, shape index: {0}]   ;;  %s1999_s6 = inlined_call_operand.hbm [shape: f32[2,8,8], index: 6, kind: output, shape index: {1}]  }
   0x1   :  { %v12_v0 = vstv %s1997_s4 }
   0x2   :  { %13 = vst [vmem:[#allocation2] sm:$0x1] %v12_v0 }
   0x3   :  { %14 = vsyncpa [#allocation4], 0 }
   0x4   :  { %15 = vsyncpa [#allocation7], 0 }
   0x5   :  { %16 = vsyncpa [#allocation5], 0 }
   0x6   :  { %17 = vsyncpa [#allocation10], 0  ;;  %s1473_s23 = smov [#allocation3]   ;;  %s1377_s27 = scalar_lea.hbm %s1993_s0, 256 }
   0x7   :  { %s23_s24 = sshll.u32 %s1473_s23, 4  ;;  %p1378_p0 = scmp.ne.s32.totalorder %s1993_s0, %s1377_s27  ;;  %s24_s24 = int_to_ptr.vmem [resolvable:$true] %s23_s24 }
   0x8   :  { %p1381_p1 = scmp.lt.u32.totalorder %s1377_s27, %s1993_s0 }
   0xa   :  { %p1383_p2 = pnand %p1381_p1, %p1378_p0 }
   0xc   :  { %1386 = shalt.err (!%p1383_p2)
}
   0xd   :  { %s1387_s4 = scalar_lea.vmem %s24_s24, 256  ;;  %p1392_p4 = scmp.lt.s32.totalorder %s24_s24, %s24_s24 }
   0xe   :  { %p1388_p3 = scmp.ne.s32.totalorder %s24_s24, %s1387_s4  ;;  %p1393_p5 = scmp.lt.s32.totalorder %s1387_s4, %s1387_s4 }
  0x10   :  { %p1394_p6 = por %p1393_p5, %p1392_p4 }
  0x12   :  { %p1395_p7 = pnand %p1394_p6, %p1388_p3 }
  0x14   :  { %1398 = shalt.err (!%p1395_p7)
}
  0x15   :  { %s1474_s8 = smov 128   ;;  %s1475_s9 = smov 8  }
  0x16   :  { %29 = dma.hbm_to_vmem [thread:$0]  %s1993_s0, 256, %s24_s24, [#allocation4], %s1474_s8, %s1474_s8, %s1475_s9  }
  0x17   :  { %s1476_s12 = smov [#allocation6]   ;;  %s1399_s16 = scalar_lea.hbm %s1994_s1, 512 }
  0x18   :  { %s35_s13 = sshll.u32 %s1476_s12, 4  ;;  %p1400_p8 = scmp.ne.s32.totalorder %s1994_s1, %s1399_s16  ;;  %s36_s13 = int_to_ptr.vmem [resolvable:$true] %s35_s13 }
  0x19   :  { %p1403_p9 = scmp.lt.u32.totalorder %s1399_s16, %s1994_s1 }
  0x1b   :  { %p1405_p10 = pnand %p1403_p9, %p1400_p8 }
  0x1d   :  { %1408 = shalt.err (!%p1405_p10)
}
  0x1e   :  { %s1409_s21 = scalar_lea.vmem %s36_s13, 512  ;;  %p1414_p12 = scmp.lt.s32.totalorder %s36_s13, %s36_s13 }
  0x1f   :  { %p1410_p11 = scmp.ne.s32.totalorder %s36_s13, %s1409_s21  ;;  %p1415_p13 = scmp.lt.s32.totalorder %s1409_s21, %s1409_s21 }
  0x21   :  { %p1416_p0 = por %p1415_p13, %p1414_p12 }
  0x23   :  { %p1417_p1 = pnand %p1416_p0, %p1410_p11 }
  0x25   :  { %1420 = shalt.err (!%p1417_p1)
}
  0x26   :  { %41 = dma.hbm_to_vmem [thread:$0]  %s1994_s1, 512, %s36_s13, [#allocation7], %s1474_s8, %s1474_s8, %s1475_s9  }
  0x27   :  { %1465 = dma.done.wait [#allocation4], 256  }
  0x28   :  { %1466 = vsyncadd [#allocation4], 4294967040 }
  0x29   :  { %1467 = dma.done.wait [#allocation7], 512  }
  0x2a   :  { %1468 = vsyncadd [#allocation7], 4294966784  ;;  %vm64_vm0 = vcmask 261120   ;;  %v56_v1 = vld [vmem:[#allocation6] sm:$0xff]  ;;  %v57_v2 = vld [vmem:[#allocation6 + $0x8] sm:$0xff]  ;;  %s1477_s1 = smov 96   ;;  %v158_v14 = vlaneseq }
  0x2b   :  { %v58_v3 = vld [vmem:[#allocation6 + $0x10] sm:$0xff]  ;;  %v1318_v4 = vpack.c.bf16 %v57_v2, %v56_v1  ;;  %v59_v5 = vld [vmem:[#allocation6 + $0x18] sm:$0xff]  ;;  %v62_v11 = vld [vmem:[#allocation2] sm:$0x1]  ;;  %v1478_v12 = vmov 1966171168  }
  0x2c   :  { %v1552_v6 = vld [vmem:[#allocation3] sm:$0xff]  ;;  %v1322_v7 = vpack.c.bf16 %v59_v5, %v58_v3  ;;  %v1556_v8 = vld [vmem:[#allocation3 + $0x8] sm:$0xff]  ;;  %1326 = vpush %v62_v11  ;;  %v156_v13 = vunpack.c.l.s4 %v1478_v12  ;;  %v1283_v15 = vld [vmem:[%s1995_s2] ss:$0 sm:$0xff]  ;;  %v1564_v17 = vshrl.u32 %v158_v14, 7  ;;  %vm352_vm1 = vcmask 1041409  }
  0x2d   :  { %1305 = vmatprep.mubr.msk.f32.mxu0 %vm64_vm0, %v1552_v6  ;;  %1319 = vmatprep.subr.bf16.mxu0 %v1318_v4  ;;  %v1589_v39 = vld [vmem:[%s1996_s3] ss:$0 sm:$0xff]  ;;  %vm354_vm2 = vcmask 1042434   ;;  %vm356_vm3 = vcmask 1043459   ;;  %vm358_vm4 = vcmask 1044484   ;;  %vm360_vm5 = vcmask 1045509  }
  0x2e   :  { %1321 = vmatpush3.bf16.msra.mxu0 %v1318_v4  ;;  %v157_v16 = vunpack.c.0.s8 %v156_v13  ;;  %v1580_v32 = vsub.s32 0, %v1564_v17  ;;  %vm362_vm6 = vcmask 1046534   ;;  %vm364_vm7 = vcmask 1047559   ;;  %s1482_s26 = smov [#allocation9]  }
  0x2f   :  { %1323 = vmatprep.subr.bf16.mxu0 %v1322_v7  ;;  %vm367_vm8 = vcmask 64512   ;;  %vm1481_vm9 = vmmov 0   ;;  %s1264_s27 = sshll.u32 %s1482_s26, 4  ;;  %s1265_s27 = int_to_ptr.vmem [resolvable:$true] %s1264_s27 }
  0x30   :  { %v1569_v20 = vsub.s32 %v157_v16, %v1564_v17  ;;  %s1421_s28 = scalar_lea.vmem %s1265_s27, 256  ;;  %p1426_p3 = scmp.lt.s32.totalorder %s1265_s27, %s1265_s27 }
  0x31   :  { %p1422_p2 = scmp.ne.s32.totalorder %s1265_s27, %s1421_s28  ;;  %p1427_p4 = scmp.lt.s32.totalorder %s1421_s28, %s1421_s28 }
  0x32   :  { %1325 = vmatpush3.bf16.msra.mxu0 %v1322_v7 }
  0x33   :  { %p1428_p5 = por %p1427_p4, %p1426_p3 }
  0x35   :  { %1306 = vmatmul.mubr.msk.f32.vlgmr.msra.gmra.mrb[0].mxu0 %vm64_vm0, %v1556_v8  ;;  %p1429_p6 = pnand %p1428_p5, %p1422_p2 }
  0x5d   :  { %s1327_s3 = spop %1326 }
 0x108   :  { %v1307_v9 = vpop.f32.mrb[0].mxu0 }
 0x109   :  { %v137_v10 = vpop.f32.mrb[1].mxu0  ;;  %v707_v18 = vadd.f32 %v1307_v9, %v1283_v15 }
 0x10a   :  { %244 = vrot.lane.b32.xlu0 %v137_v10, %s1477_s1  ;;  %v1566_v19 = vadd.f32 %v1283_v15, %v137_v10 }
 0x10b   :  { %v709_v21 = vcombine.high %v707_v18, %v707_v18  ;;  %v716_v23 = vrot.slane %v707_v18, %v1569_v20 }
 0x10c   :  { %v161_v22 = vrot.slane %v1566_v19, %v1569_v20  ;;  %v154_v11 = vcombine.high %v1566_v19, %v1566_v19 }
 0x10d   :  { %v723_v24 = vrot.slane %v709_v21, %v1569_v20  ;;  %v724_v26 = vcombine.high %v716_v23, %v716_v23  ;;  %v732_v30 = vrot.slane %v716_v23, %v1569_v20 }
 0x10e   :  { %799 = vrot.lane.b32.xlu0 %v1307_v9, %s1477_s1  ;;  %v177_v25 = vrot.slane %v161_v22, %v1569_v20  ;;  %v169_v44 = vcombine.high %v161_v22, %v161_v22  ;;  %v168_v23 = vrot.slane %v154_v11, %v1569_v20 }
 0x10f   :  { %v725_v27 = vcombine.high %v723_v24, %v723_v24  ;;  %v746_v29 = vrot.slane %v724_v26, %v1569_v20  ;;  %v754_v35 = vcombine.high %v732_v30, %v732_v30  ;;  %v761_v41 = vrot.slane %v732_v30, %v1580_v32 }
 0x110   :  { %v199_v28 = vcombine.high %v177_v25, %v177_v25  ;;  %v191_v60 = vrot.slane %v169_v44, %v1569_v20  ;;  %v206_v61 = vrot.slane %v177_v25, %v1580_v32  ;;  %v739_v12 = vrot.slane %v723_v24, %v1569_v20 }
 0x111   :  { %v753_v31 = vrot.slane %v725_v27, %v1569_v20  ;;  %v756_v34 = vcombine.high %v746_v29, %v746_v29  ;;  %v765_v43 = vrot.slane %v746_v29, %v1580_v32  ;;  %v769_v47 = vrot.slane %v754_v35, %v1580_v32 }
 0x112   :  { %v214_v33 = vrot.slane %v199_v28, %v1580_v32  ;;  %v210_v10 = vrot.slane %v191_v60, %v1580_v32  ;;  %v201_v25 = vcombine.high %v191_v60, %v191_v60  ;;  %v777_v19 = vrot.slane %v739_v12, %v1580_v32 }
 0x113   :  { %v757_v37 = vcombine.high %v753_v31, %v753_v31  ;;  %v773_v42 = vrot.slane %v756_v34, %v1580_v32  ;;  %v781_v46 = vrot.slane %v753_v31, %v1580_v32  ;;  %v170_v30 = vcombine.high %v168_v23, %v168_v23 }
 0x114   :  { %v184_v31 = vrot.slane %v168_v23, %v1569_v20  ;;  %v319_v23 = vand.u32 127, %v158_v14 }
 0x115   :  { %v789_v48 = vrot.slane %v757_v37, %v1580_v32 }
 0x17c   :  { %v1583_v36 = vpop.permute.xlu0 %244 }
 0x17d   :  { %v249_v38 = vadd.f32 %v1583_v36, %v214_v33  ;;  %v247_v3 = vadd.f32 %v1583_v36, %v206_v61  ;;  %v248_v15 = vadd.f32 %v1583_v36, %v210_v10  ;;  %v218_v33 = vrot.slane %v201_v25, %v1580_v32 }
 0x17e   :  { %v301_v25 = vstv %s1327_s3 }
 0x17f   :  { %v257_v40 = vmax.f32 %v249_v38, 0.0  ;;  %v255_v13 = vmax.f32 %v247_v3, 0.0  ;;  %v256_v26 = vmax.f32 %v248_v15, 0.0  ;;  %v250_v38 = vadd.f32 %v1583_v36, %v218_v33 }
 0x180   :  { %v1594_v45 = vpop.permute.xlu0 %799 }
 0x181   :  { %v271_v49 = vmul.f32 %v1589_v39, %v257_v40  ;;  %v802_v50 = vadd.f32 %v1594_v45, %v761_v41  ;;  %v805_v51 = vadd.f32 %v1594_v45, %v773_v42  ;;  %v803_v52 = vadd.f32 %v1594_v45, %v765_v43 }
 0x182   :  { %v807_v53 = vadd.f32 %v1594_v45, %v781_v46  ;;  %v804_v54 = vadd.f32 %v1594_v45, %v769_v47  ;;  %v809_v55 = vadd.f32 %v1594_v45, %v789_v48  ;;  %v269_v28 = vmul.f32 %v1589_v39, %v255_v13 }
 0x183   :  { %v283_v56 = vsel %vm64_vm0, %v271_v49, 0.0  ;;  %v810_v57 = vmax.f32 %v802_v50, 0.0  ;;  %v813_v58 = vmax.f32 %v805_v51, 0.0  ;;  %v811_v59 = vmax.f32 %v803_v52, 0.0 }
 0x184   :  { %284 = vadd.xlane.f32.xlu0 %v283_v56  ;;  %v815_v62 = vmax.f32 %v807_v53, 0.0  ;;  %v812_v1 = vmax.f32 %v804_v54, 0.0  ;;  %v817_v2 = vmax.f32 %v809_v55, 0.0  ;;  %v806_v29 = vadd.f32 %v1594_v45, %v777_v19 }
 0x185   :  { %v818_v63 = vmul.f32 %v1589_v39, %v810_v57  ;;  %v821_v0 = vmul.f32 %v1589_v39, %v813_v58  ;;  %v819_v7 = vmul.f32 %v1589_v39, %v811_v59  ;;  %v277_v34 = vsel %vm64_vm0, %v269_v28, 0.0 }
 0x186   :  { %v823_v9 = vmul.f32 %v1589_v39, %v815_v62  ;;  %v820_v21 = vmul.f32 %v1589_v39, %v812_v1  ;;  %v825_v22 = vmul.f32 %v1589_v39, %v817_v2  ;;  %v270_v35 = vmul.f32 %v1589_v39, %v256_v26 }
 0x187   :  { %v826_v4 = vsel %vm64_vm0, %v818_v63, 0.0  ;;  %v835_v5 = vsel %vm64_vm0, %v821_v0, 0.0  ;;  %v829_v16 = vsel %vm64_vm0, %v819_v7, 0.0  ;;  %v814_v37 = vmax.f32 %v806_v29, 0.0 }
 0x188   :  { %827 = vadd.xlane.f32.xlu1 %v826_v4  ;;  %836 = vadd.xlane.f32.xlu0 %v835_v5  ;;  %v841_v18 = vsel %vm64_vm0, %v823_v9, 0.0  ;;  %v832_v24 = vsel %vm64_vm0, %v820_v21, 0.0  ;;  %v847_v27 = vsel %vm64_vm0, %v825_v22, 0.0  ;;  %v198_v40 = vrot.slane %v170_v30, %v1569_v20 }
 0x189   :  { %v222_v41 = vrot.slane %v184_v31, %v1580_v32  ;;  %v280_v42 = vsel %vm64_vm0, %v270_v35, 0.0  ;;  %v822_v43 = vmul.f32 %v1589_v39, %v814_v37  ;;  %v258_v44 = vmax.f32 %v250_v38, 0.0 }
 0x18a   :  { %v200_v47 = vcombine.high %v184_v31, %v184_v31  ;;  %v226_v48 = vrot.slane %v198_v40, %v1580_v32  ;;  %v202_v53 = vcombine.high %v198_v40, %v198_v40  ;;  %v755_v59 = vcombine.high %v739_v12, %v739_v12 }
 0x18b   :  { %v251_v46 = vadd.f32 %v1583_v36, %v222_v41  ;;  %v838_v49 = vsel %vm64_vm0, %v822_v43, 0.0  ;;  %v272_v50 = vmul.f32 %v1589_v39, %v258_v44 }
 0x18c   :  { %830 = vadd.xlane.f32.xlu1 %v829_v16  ;;  %842 = vadd.xlane.f32.xlu0 %v841_v18  ;;  %v252_v20 = vadd.f32 %v1583_v36, %v226_v48  ;;  %v230_v52 = vrot.slane %v200_v47, %v1580_v32  ;;  %v234_v58 = vrot.slane %v202_v53, %v1580_v32 }
 0x18d   :  { %v259_v51 = vmax.f32 %v251_v46, 0.0  ;;  %v286_v54 = vsel %vm64_vm0, %v272_v50, 0.0  ;;  %v785_v0 = vrot.slane %v755_v59, %v1580_v32 }
 0x18e   :  { %v260_v56 = vmax.f32 %v252_v20, 0.0  ;;  %v253_v57 = vadd.f32 %v1583_v36, %v230_v52  ;;  %v254_v63 = vadd.f32 %v1583_v36, %v234_v58 }
 0x18f   :  { %v273_v55 = vmul.f32 %v1589_v39, %v259_v51  ;;  %v808_v4 = vadd.f32 %v1594_v45, %v785_v0 }
 0x190   :  { %833 = vadd.xlane.f32.xlu1 %v832_v24  ;;  %848 = vadd.xlane.f32.xlu0 %v847_v27  ;;  %v274_v61 = vmul.f32 %v1589_v39, %v260_v56  ;;  %v261_v62 = vmax.f32 %v253_v57, 0.0  ;;  %v262_v3 = vmax.f32 %v254_v63, 0.0 }
 0x191   :  { %v289_v60 = vsel %vm64_vm0, %v273_v55, 0.0  ;;  %v816_v9 = vmax.f32 %v808_v4, 0.0 }
 0x192   :  { %v292_v1 = vsel %vm64_vm0, %v274_v61, 0.0  ;;  %v275_v2 = vmul.f32 %v1589_v39, %v261_v62  ;;  %v276_v7 = vmul.f32 %v1589_v39, %v262_v3 }
 0x193   :  { %v824_v36 = vmul.f32 %v1589_v39, %v816_v9  ;;  %v1666_v39 = vsub.s32 %v319_v23, %v1564_v17  ;;  %v1741_v23 = vsub.s32 1, %v1564_v17 }
 0x194   :  { %278 = vadd.xlane.f32.xlu1 %v277_v34  ;;  %v295_v5 = vsel %vm64_vm0, %v275_v2, 0.0  ;;  %v298_v10 = vsel %vm64_vm0, %v276_v7, 0.0 }
 0x195   :  { %v844_v11 = vsel %vm64_vm0, %v824_v36, 0.0 }
 0x198   :  { %281 = vadd.xlane.f32.xlu1 %v280_v42 }
 0x19c   :  { %839 = vadd.xlane.f32.xlu1 %v838_v49 }
 0x1a0   :  { %287 = vadd.xlane.f32.xlu1 %v286_v54 }
 0x1a4   :  { %290 = vadd.xlane.f32.xlu1 %v289_v60 }
 0x1a8   :  { %293 = vadd.xlane.f32.xlu1 %v292_v1 }
 0x1ac   :  { %296 = vadd.xlane.f32.xlu1 %v295_v5 }
 0x1b0   :  { %299 = vadd.xlane.f32.xlu1 %v298_v10 }
 0x1b4   :  { %845 = vadd.xlane.f32.xlu1 %v844_v11 }
 0x211   :  { %v285_v21 = vpop.xlane.xlu0 %284 }
 0x212   :  { %v1678_v14 = vadd.f32 %v301_v25, %v285_v21 }
 0x214   :  { %v331_v49 = vrot.slane %v1678_v14, %v1666_v39 }
 0x215   :  { %v828_v12 = vpop.xlane.xlu1 %827  ;;  %v837_v26 = vpop.xlane.xlu0 %836 }
 0x216   :  { %v1680_v34 = vadd.f32 %v828_v12, %v301_v25  ;;  %v1703_v51 = vadd.f32 %v837_v26, %v301_v25 }
 0x218   :  { %v869_v50 = vrot.slane %v1680_v34, %v1666_v39  ;;  %v881_v62 = vrot.slane %v1703_v51, %v1666_v39 }
 0x219   :  { %v831_v13 = vpop.xlane.xlu1 %830  ;;  %v843_v37 = vpop.xlane.xlu0 %842 }
 0x21a   :  { %v1670_v28 = vadd.f32 %v831_v13, %v301_v25  ;;  %v1719_v63 = vadd.f32 %v843_v37, %v301_v25  ;;  %v1751_v37 = vsub.s32 4, %v1564_v17 }
 0x21c   :  { %v873_v41 = vrot.slane %v1670_v28, %v1666_v39  ;;  %v889_v11 = vrot.slane %v1719_v63, %v1666_v39 }
 0x21d   :  { %v834_v15 = vpop.xlane.xlu1 %833  ;;  %v849_v58 = vpop.xlane.xlu0 %848 }
 0x21e   :  { %v1672_v29 = vadd.f32 %v834_v15, %v301_v25  ;;  %v898_v53 = vsel %vm352_vm1, %v873_v41, %v869_v50  ;;  %v1724_v3 = vadd.f32 %v849_v58, %v301_v25 }
 0x220   :  { %v877_v42 = vrot.slane %v1672_v29, %v1666_v39  ;;  %v897_v15 = vrot.slane %v1724_v3, %v1666_v39 }
 0x221   :  { %v279_v16 = vpop.xlane.xlu1 %278 }
 0x222   :  { %v1668_v27 = vadd.f32 %v301_v25, %v279_v16  ;;  %v899_v57 = vsel %vm354_vm2, %v877_v42, %v898_v53 }
 0x223   :  { %v900_v4 = vsel %vm356_vm3, %v881_v62, %v899_v57 }
 0x224   :  { %v323_v38 = vrot.slane %v1668_v27, %v1666_v39 }
 0x225   :  { %v282_v45 = vpop.xlane.xlu1 %281 }
 0x226   :  { %v1663_v24 = vadd.f32 %v301_v25, %v282_v45 }
 0x228   :  { %v327_v31 = vrot.slane %v1663_v24, %v1666_v39 }
 0x229   :  { %v840_v18 = vpop.xlane.xlu1 %839 }
 0x22a   :  { %v353_v44 = vsel %vm352_vm1, %v327_v31, %v323_v38  ;;  %v1693_v46 = vadd.f32 %v840_v18, %v301_v25  ;;  %v1754_v38 = vsub.s32 7, %v1564_v17 }
 0x22b   :  { %v355_v54 = vsel %vm354_vm2, %v331_v49, %v353_v44 }
 0x22c   :  { %v885_v59 = vrot.slane %v1693_v46, %v1666_v39 }
 0x22d   :  { %v288_v22 = vpop.xlane.xlu1 %287 }
 0x22e   :  { %v1676_v33 = vadd.f32 %v301_v25, %v288_v22  ;;  %v901_v9 = vsel %vm358_vm4, %v885_v59, %v900_v4  ;;  %v1479_v22 = vmov 0  }
 0x22f   :  { %v902_v16 = vsel %vm360_vm5, %v889_v11, %v901_v9  ;;  %1340 = vset.pattern.permute.xlu0 %v1479_v22  ;;  %1339 = vset.pattern.permute.xlu1 %v1479_v22 }
 0x230   :  { %v335_v47 = vrot.slane %v1676_v33, %v1666_v39 }
 0x231   :  { %v291_v19 = vpop.xlane.xlu1 %290 }
 0x232   :  { %v1682_v35 = vadd.f32 %v301_v25, %v291_v19  ;;  %v357_v60 = vsel %vm356_vm3, %v335_v47, %v355_v54  ;;  %v1776_v54 = vsub.s32 6, %v1564_v17 }
 0x234   :  { %v339_v20 = vrot.slane %v1682_v35, %v1666_v39 }
 0x235   :  { %v294_v30 = vpop.xlane.xlu1 %293 }
 0x236   :  { %v1686_v40 = vadd.f32 %v301_v25, %v294_v30  ;;  %v359_v0 = vsel %vm358_vm4, %v339_v20, %v357_v60 }
 0x238   :  { %v343_v52 = vrot.slane %v1686_v40, %v1666_v39 }
 0x239   :  { %v297_v43 = vpop.xlane.xlu1 %296 }
 0x23a   :  { %v1697_v48 = vadd.f32 %v301_v25, %v297_v43  ;;  %v361_v2 = vsel %vm360_vm5, %v343_v52, %v359_v0  ;;  %v1773_v52 = vsub.s32 3, %v1564_v17 }
 0x23c   :  { %v347_v55 = vrot.slane %v1697_v48, %v1666_v39 }
 0x23d   :  { %v300_v56 = vpop.xlane.xlu1 %299 }
 0x23e   :  { %v309_v61 = vadd.f32 %v301_v25, %v300_v56  ;;  %v363_v7 = vsel %vm362_vm6, %v347_v55, %v361_v2 }
 0x240   :  { %v351_v1 = vrot.slane %v309_v61, %v1666_v39 }
 0x241   :  { %v846_v5 = vpop.xlane.xlu1 %845 }
 0x242   :  { %v856_v10 = vadd.f32 %v846_v5, %v301_v25  ;;  %v365_v36 = vsel %vm364_vm7, %v351_v1, %v363_v7 }
 0x243   :  { %v368_v12 = vsel %vm367_vm8, %v365_v36, -inf }
 0x244   :  { %v893_v13 = vrot.slane %v856_v10, %v1666_v39  ;;  %369 = vmax.xlane.f32.xlu1 %v368_v12 }
 0x246   :  { %v903_v45 = vsel %vm362_vm6, %v893_v13, %v902_v16 }
 0x247   :  { %v904_v18 = vsel %vm364_vm7, %v897_v15, %v903_v45 }
 0x248   :  { %v906_v21 = vsel %vm367_vm8, %v904_v18, -inf }
 0x249   :  { %907 = vmax.xlane.f32.xlu0 %v906_v21 }
 0x2d1   :  { %v1743_v25 = vpop.xlane.xlu1 %369 }
 0x2d2   :  { %v379_v19 = vrot.slane %v1743_v25, %v1741_v23  ;;  %v403_v44 = vrot.slane %v1743_v25, %v1754_v38  ;;  %v391_v11 = vrot.slane %v1743_v25, %v1751_v37  ;;  %v399_v21 = vrot.slane %v1743_v25, %v1776_v54 }
 0x2d4   :  { %v413_v26 = vsub.f32 %v1663_v24, %v379_v19  ;;  %v1763_v24 = vsub.s32 2, %v1564_v17  ;;  %v419_v55 = vsub.f32 %v309_v61, %v403_v44  ;;  %v375_v61 = vrot.slane %v1743_v25, %v1580_v32 }
 0x2d5   :  { %v416_v16 = vsub.f32 %v1682_v35, %v391_v11  ;;  %v418_v35 = vsub.f32 %v1697_v48, %v399_v21 }
 0x2d6   :  { %v422_v30 = vmul.f32 1.442695, %v413_v26  ;;  %v1748_v31 = vpop.xlane.xlu0 %907  ;;  %v434_v59 = vmul.f32 1.442695, %v419_v55  ;;  %v412_v2 = vsub.f32 %v1668_v27, %v375_v61  ;;  %v1803_v27 = vsub.s32 5, %v1564_v17 }
 0x2d7   :  { %v913_v41 = vrot.slane %v1748_v31, %v1580_v32  ;;  %v917_v42 = vrot.slane %v1748_v31, %v1741_v23  ;;  %v929_v43 = vrot.slane %v1748_v31, %v1751_v37  ;;  %v921_v50 = vrot.slane %v1748_v31, %v1763_v24 }
 0x2d8   :  { %1341 = vpow2.f32 %v422_v30  ;;  %v925_v56 = vrot.slane %v1748_v31, %v1773_v52  ;;  %v420_v9 = vmul.f32 1.442695, %v412_v2  ;;  %v395_v17 = vrot.slane %v1743_v25, %v1803_v27 }
 0x2d9   :  { %v950_v47 = vsub.f32 %v1680_v34, %v913_v41  ;;  %v951_v49 = vsub.f32 %v1670_v28, %v917_v42  ;;  %v954_v20 = vsub.f32 %v1693_v46, %v929_v43  ;;  %v937_v28 = vrot.slane %v1748_v31, %v1776_v54 }
 0x2da   :  { %v952_v34 = vsub.f32 %v1672_v29, %v921_v50  ;;  %v953_v60 = vsub.f32 %v1703_v51, %v925_v56  ;;  %v383_v29 = vrot.slane %v1743_v25, %v1763_v24  ;;  %v387_v51 = vrot.slane %v1743_v25, %v1773_v52 }
 0x2db   :  { %v958_v53 = vmul.f32 1.442695, %v950_v47  ;;  %v960_v57 = vmul.f32 1.442695, %v951_v49  ;;  %v966_v58 = vmul.f32 1.442695, %v954_v20  ;;  %v956_v62 = vsub.f32 %v856_v10, %v937_v28 }
 0x2dc   :  { %v962_v0 = vmul.f32 1.442695, %v952_v34  ;;  %v964_v1 = vmul.f32 1.442695, %v953_v60  ;;  %v414_v7 = vsub.f32 %v1678_v14, %v383_v29  ;;  %v415_v12 = vsub.f32 %v1676_v33, %v387_v51 }
 0x2dd   :  { %1343 = vpow2.f32 %v958_v53  ;;  %v970_v4 = vmul.f32 1.442695, %v956_v62  ;;  %v417_v22 = vsub.f32 %v1686_v40, %v395_v17  ;;  %v428_v19 = vmul.f32 1.442695, %v416_v16 }
 0x2de   :  { %1345 = vpow2.f32 %v960_v57  ;;  %v424_v14 = vmul.f32 1.442695, %v414_v7  ;;  %v426_v45 = vmul.f32 1.442695, %v415_v12  ;;  %v933_v41 = vrot.slane %v1748_v31, %v1803_v27 }
 0x2df   :  { %1347 = vpow2.f32 %v966_v58  ;;  %v430_v30 = vmul.f32 1.442695, %v417_v22  ;;  %v432_v25 = vmul.f32 1.442695, %v418_v35  ;;  %v941_v40 = vrot.slane %v1748_v31, %v1754_v38 }
 0x2e0   :  { %1349 = vpow2.f32 %v434_v59  ;;  %v955_v43 = vsub.f32 %v1719_v63, %v933_v41 }
 0x2e1   :  { %1351 = vpow2.f32 %v962_v0  ;;  %v957_v48 = vsub.f32 %v1724_v3, %v941_v40 }
 0x2e2   :  { %v1783_v46 = vpop.eup %1341  ;;  %1353 = vpow2.f32 %v964_v1  ;;  %v968_v47 = vmul.f32 1.442695, %v955_v43 }
 0x2e3   :  { %448 = vperm.xlu0 %1340, %v1783_v46   ;;  %1355 = vpow2.f32 %v970_v4  ;;  %v972_v50 = vmul.f32 1.442695, %v957_v48 }
 0x2e4   :  { %1357 = vpow2.f32 %v420_v9 }
 0x2e5   :  { %1359 = vpow2.f32 %v424_v14 }
 0x2e6   :  { %1361 = vpow2.f32 %v426_v45 }
 0x2e7   :  { %v1792_v5 = vpop.eup %1343  ;;  %1363 = vpow2.f32 %v428_v19 }
 0x2e8   :  { %983 = vperm.xlu1 %1339, %v1792_v5   ;;  %v1798_v10 = vpop.eup %1345  ;;  %1365 = vpow2.f32 %v430_v30 }
 0x2e9   :  { %v1800_v36 = vpop.eup %1347  ;;  %1367 = vpow2.f32 %v432_v25 }
 0x2ea   :  { %995 = vperm.xlu0 %1340, %v1800_v36   ;;  %v1810_v13 = vpop.eup %1349  ;;  %1369 = vpow2.f32 %v968_v47 }
 0x2eb   :  { %v1812_v15 = vpop.eup %1351  ;;  %1371 = vpow2.f32 %v972_v50 }
 0x2ec   :  { %986 = vperm.xlu1 %1339, %v1798_v10   ;;  %v1819_v18 = vpop.eup %1353 }
 0x2ed   :  { %v1821_v33 = vpop.eup %1355 }
 0x2ee   :  { %466 = vperm.xlu0 %1340, %v1810_v13   ;;  %v1828_v26 = vpop.eup %1357 }
 0x2ef   :  { %v1834_v42 = vpop.eup %1359 }
 0x2f0   :  { %989 = vperm.xlu1 %1339, %v1812_v15   ;;  %v1840_v44 = vpop.eup %1361 }
 0x2f1   :  { %v1844_v49 = vpop.eup %1363 }
 0x2f2   :  { %1001 = vperm.xlu0 %1340, %v1821_v33   ;;  %v1847_v20 = vpop.eup %1365 }
 0x2f3   :  { %v1850_v63 = vpop.eup %1367 }
 0x2f4   :  { %992 = vperm.xlu1 %1339, %v1819_v18   ;;  %v1853_v31 = vpop.eup %1369 }
 0x2f5   :  { %v1856_v3 = vpop.eup %1371 }
 0x2f8   :  { %445 = vperm.xlu1 %1339, %v1828_v26  }
 0x2fc   :  { %451 = vperm.xlu1 %1339, %v1834_v42  }
 0x300   :  { %454 = vperm.xlu1 %1339, %v1840_v44  }
 0x304   :  { %457 = vperm.xlu1 %1339, %v1844_v49  }
 0x308   :  { %460 = vperm.xlu1 %1339, %v1847_v20  }
 0x30c   :  { %463 = vperm.xlu1 %1339, %v1850_v63  }
 0x310   :  { %998 = vperm.xlu1 %1339, %v1853_v31  }
 0x314   :  { %1004 = vperm.xlu1 %1339, %v1856_v3  }
 0x362   :  { %v449_v58 = vpop.permute.xlu0 %448 }
 0x363   :  { %v475_v1 = vrot.slane %v449_v58, %v1666_v39 }
 0x367   :  { %v984_v53 = vpop.permute.xlu1 %983 }
 0x368   :  { %v1009_v12 = vrot.slane %v984_v53, %v1666_v39 }
 0x369   :  { %v996_v61 = vpop.permute.xlu0 %995 }
 0x36a   :  { %v1025_v48 = vrot.slane %v996_v61, %v1666_v39 }
 0x36b   :  { %v987_v55 = vpop.permute.xlu1 %986 }
 0x36c   :  { %v1013_v4 = vrot.slane %v987_v55, %v1666_v39 }
 0x36d   :  { %v467_v14 = vpop.permute.xlu0 %466 }
 0x36e   :  { %v1038_v22 = vsel %vm352_vm1, %v1013_v4, %v1009_v12  ;;  %v499_v30 = vrot.slane %v467_v14, %v1666_v39 }
 0x36f   :  { %v990_v56 = vpop.permute.xlu1 %989 }
 0x370   :  { %v1017_v7 = vrot.slane %v990_v56, %v1666_v39 }
 0x371   :  { %v1002_v53 = vpop.permute.xlu0 %1001 }
 0x372   :  { %v1039_v41 = vsel %vm354_vm2, %v1017_v7, %v1038_v22 }
 0x373   :  { %v993_v57 = vpop.permute.xlu1 %992 }
 0x374   :  { %v1021_v17 = vrot.slane %v993_v57, %v1666_v39 }
 0x376   :  { %v1040_v40 = vsel %vm356_vm3, %v1021_v17, %v1039_v41  ;;  %v1480_v41 = vmov 0.0  }
 0x377   :  { %v446_v28 = vpop.permute.xlu1 %445  ;;  %v1041_v57 = vsel %vm358_vm4, %v1025_v48, %v1040_v40  ;;  %1308 = vmatprep.subr.mxu1 %v1480_v41  ;;  %1310 = vmatprep.mubr.msk.f32.mxu1 %vm1481_vm9, %v1480_v41 }
 0x378   :  { %v471_v62 = vrot.slane %v446_v28, %v1666_v39  ;;  %1309 = vmatpush3.msra.mxu1 %v1552_v6 }
 0x379   :  { %1313 = vmatprep.subr.mxu1 %v1480_v41 }
 0x37a   :  { %v500_v9 = vsel %vm352_vm1, %v475_v1, %v471_v62 }
 0x37b   :  { %v452_v34 = vpop.permute.xlu1 %451 }
 0x37c   :  { %v479_v0 = vrot.slane %v452_v34, %v1666_v39  ;;  %v1033_v34 = vrot.slane %v1002_v53, %v1666_v39 }
 0x37e   :  { %v501_v16 = vsel %vm354_vm2, %v479_v0, %v500_v9 }
 0x37f   :  { %v455_v59 = vpop.permute.xlu1 %454 }
 0x380   :  { %v483_v29 = vrot.slane %v455_v59, %v1666_v39 }
 0x382   :  { %v502_v45 = vsel %vm356_vm3, %v483_v29, %v501_v16 }
 0x383   :  { %v458_v60 = vpop.permute.xlu1 %457 }
 0x384   :  { %v487_v51 = vrot.slane %v458_v60, %v1666_v39 }
 0x386   :  { %v503_v19 = vsel %vm358_vm4, %v487_v51, %v502_v45 }
 0x387   :  { %v461_v2 = vpop.permute.xlu1 %460 }
 0x388   :  { %v491_v11 = vrot.slane %v461_v2, %v1666_v39 }
 0x38a   :  { %v504_v25 = vsel %vm360_vm5, %v491_v11, %v503_v19 }
 0x38b   :  { %v464_v21 = vpop.permute.xlu1 %463 }
 0x38c   :  { %v495_v35 = vrot.slane %v464_v21, %v1666_v39 }
 0x38e   :  { %v505_v43 = vsel %vm362_vm6, %v495_v35, %v504_v25 }
 0x38f   :  { %v999_v47 = vpop.permute.xlu1 %998  ;;  %v506_v50 = vsel %vm364_vm7, %v499_v30, %v505_v43 }
 0x390   :  { %v1029_v55 = vrot.slane %v999_v47, %v1666_v39  ;;  %v508_v56 = vsel %vm367_vm8, %v506_v50, 0.0 }
 0x391   :  { %509 = vadd.xlane.f32.xlu0 %v508_v56 }
 0x392   :  { %v1042_v28 = vsel %vm360_vm5, %v1029_v55, %v1041_v57 }
 0x393   :  { %v1005_v58 = vpop.permute.xlu1 %1004  ;;  %v1043_v60 = vsel %vm362_vm6, %v1033_v34, %v1042_v28 }
 0x394   :  { %v1037_v59 = vrot.slane %v1005_v58, %v1666_v39 }
 0x396   :  { %v1044_v61 = vsel %vm364_vm7, %v1037_v59, %v1043_v60 }
 0x397   :  { %v1046_v62 = vsel %vm367_vm8, %v1044_v61, 0.0 }
 0x398   :  { %1047 = vadd.xlane.f32.xlu1 %v1046_v62 }
 0x41e   :  { %v510_v1 = vpop.xlane.xlu0 %509 }
 0x425   :  { %v1048_v0 = vpop.xlane.xlu1 %1047 }
 0x426   :  { %1373 = vrcp.f32 %v1048_v0 }
 0x427   :  { %1375 = vrcp.f32 %v510_v1 }
 0x430   :  { %v1374_v29 = vpop.eup %1373 }
 0x431   :  { %v1058_v2 = vrot.slane %v1374_v29, %v1741_v23  ;;  %v1054_v4 = vrot.slane %v1374_v29, %v1580_v32  ;;  %v1062_v9 = vrot.slane %v1374_v29, %v1763_v24  ;;  %v1070_v11 = vrot.slane %v1374_v29, %v1751_v37  ;;  %v1376_v12 = vpop.eup %1375 }
 0x432   :  { %v1066_v16 = vrot.slane %v1374_v29, %v1773_v52  ;;  %v516_v45 = vrot.slane %v1376_v12, %v1580_v32  ;;  %v520_v21 = vrot.slane %v1376_v12, %v1741_v23  ;;  %v524_v22 = vrot.slane %v1376_v12, %v1763_v24 }
 0x433   :  { %v1092_v51 = vmul.f32 %v1798_v10, %v1058_v2  ;;  %v1091_v7 = vmul.f32 %v1792_v5, %v1054_v4  ;;  %v1093_v14 = vmul.f32 %v1812_v15, %v1062_v9  ;;  %v1095_v17 = vmul.f32 %v1800_v36, %v1070_v11 }
 0x434   :  { %v1094_v10 = vmul.f32 %v1819_v18, %v1066_v16  ;;  %v553_v5 = vmul.f32 %v1828_v26, %v516_v45  ;;  %v554_v15 = vmul.f32 %v1783_v46, %v520_v21  ;;  %v555_v36 = vmul.f32 %v1834_v42, %v524_v22 }
 0x435   :  { %1111 = vperm.xlu1 %1339, %v1092_v51   ;;  %1108 = vperm.xlu0 %1340, %v1091_v7   ;;  %v528_v19 = vrot.slane %v1376_v12, %v1773_v52  ;;  %v532_v32 = vrot.slane %v1376_v12, %v1751_v37  ;;  %v536_v23 = vrot.slane %v1376_v12, %v1803_v27 }
 0x436   :  { %v540_v24 = vrot.slane %v1376_v12, %v1776_v54  ;;  %v1074_v52 = vrot.slane %v1374_v29, %v1803_v27  ;;  %v544_v37 = vrot.slane %v1376_v12, %v1754_v38  ;;  %v1082_v35 = vrot.slane %v1374_v29, %v1754_v38 }
 0x437   :  { %v556_v18 = vmul.f32 %v1840_v44, %v528_v19  ;;  %v557_v26 = vmul.f32 %v1844_v49, %v532_v32  ;;  %v558_v46 = vmul.f32 %v1847_v20, %v536_v23  ;;  %v1078_v30 = vrot.slane %v1374_v29, %v1776_v54 }
 0x438   :  { %v559_v42 = vmul.f32 %v1850_v63, %v540_v24  ;;  %v1096_v44 = vmul.f32 %v1853_v31, %v1074_v52  ;;  %v560_v49 = vmul.f32 %v1810_v13, %v544_v37  ;;  %v1098_v20 = vmul.f32 %v1856_v3, %v1082_v35 }
 0x439   :  { %1114 = vperm.xlu1 %1339, %v1093_v14   ;;  %1120 = vperm.xlu0 %1340, %v1095_v17   ;;  %v1097_v63 = vmul.f32 %v1821_v33, %v1078_v30 }
 0x43d   :  { %1117 = vperm.xlu1 %1339, %v1094_v10   ;;  %570 = vperm.xlu0 %1340, %v553_v5  }
 0x441   :  { %573 = vperm.xlu1 %1339, %v554_v15   ;;  %576 = vperm.xlu0 %1340, %v555_v36  }
 0x445   :  { %579 = vperm.xlu1 %1339, %v556_v18   ;;  %582 = vperm.xlu0 %1340, %v557_v26  }
 0x449   :  { %585 = vperm.xlu1 %1339, %v558_v46   ;;  %588 = vperm.xlu0 %1340, %v559_v42  }
 0x44d   :  { %1123 = vperm.xlu1 %1339, %v1096_v44   ;;  %591 = vperm.xlu0 %1340, %v560_v49  }
 0x451   :  { %1129 = vperm.xlu1 %1339, %v1098_v20   ;;  %1126 = vperm.xlu0 %1340, %v1097_v63  }
 0x4b4   :  { %v1112_v27 = vpop.permute.xlu1 %1111  ;;  %v1109_v38 = vpop.permute.xlu0 %1108 }
 0x4b5   :  { %v1138_v28 = vrot.slane %v1112_v27, %v1666_v39  ;;  %v1134_v34 = vrot.slane %v1109_v38, %v1666_v39 }
 0x4b7   :  { %v1163_v2 = vsel %vm352_vm1, %v1138_v28, %v1134_v34 }
 0x4b8   :  { %v1115_v13 = vpop.permute.xlu1 %1114  ;;  %v1121_v54 = vpop.permute.xlu0 %1120 }
 0x4b9   :  { %v1142_v60 = vrot.slane %v1115_v13, %v1666_v39  ;;  %v1150_v17 = vrot.slane %v1121_v54, %v1666_v39 }
 0x4bb   :  { %v1164_v7 = vsel %vm354_vm2, %v1142_v60, %v1163_v2 }
 0x4bc   :  { %v1118_v31 = vpop.permute.xlu1 %1117  ;;  %v571_v25 = vpop.permute.xlu0 %570 }
 0x4bd   :  { %v596_v33 = vrot.slane %v571_v25, %v1666_v39  ;;  %v1146_v62 = vrot.slane %v1118_v31, %v1666_v39 }
 0x4bf   :  { %v1165_v11 = vsel %vm356_vm3, %v1146_v62, %v1164_v7 }
 0x4c0   :  { %v574_v40 = vpop.permute.xlu1 %573  ;;  %v577_v3 = vpop.permute.xlu0 %576  ;;  %v1166_v5 = vsel %vm358_vm4, %v1150_v17, %v1165_v11 }
 0x4c1   :  { %v600_v43 = vrot.slane %v574_v40, %v1666_v39  ;;  %v604_v48 = vrot.slane %v577_v3, %v1666_v39 }
 0x4c3   :  { %v625_v47 = vsel %vm352_vm1, %v600_v43, %v596_v33 }
 0x4c4   :  { %v580_v50 = vpop.permute.xlu1 %579  ;;  %v583_v53 = vpop.permute.xlu0 %582  ;;  %v626_v55 = vsel %vm354_vm2, %v604_v48, %v625_v47 }
 0x4c5   :  { %v608_v6 = vrot.slane %v580_v50, %v1666_v39  ;;  %v612_v56 = vrot.slane %v583_v53, %v1666_v39 }
 0x4c7   :  { %v627_v57 = vsel %vm356_vm3, %v608_v6, %v626_v55 }
 0x4c8   :  { %v586_v58 = vpop.permute.xlu1 %585  ;;  %v589_v59 = vpop.permute.xlu0 %588  ;;  %v628_v0 = vsel %vm358_vm4, %v612_v56, %v627_v57 }
 0x4c9   :  { %v616_v61 = vrot.slane %v586_v58, %v1666_v39  ;;  %v620_v1 = vrot.slane %v589_v59, %v1666_v39 }
 0x4cb   :  { %v629_v29 = vsel %vm360_vm5, %v616_v61, %v628_v0 }
 0x4cc   :  { %v1124_v4 = vpop.permute.xlu1 %1123  ;;  %v592_v51 = vpop.permute.xlu0 %591  ;;  %v630_v12 = vsel %vm362_vm6, %v620_v1, %v629_v29 }
 0x4cd   :  { %v624_v9 = vrot.slane %v592_v51, %v1666_v39  ;;  %v1154_v14 = vrot.slane %v1124_v4, %v1666_v39 }
 0x4cf   :  { %v631_v16 = vsel %vm364_vm7, %v624_v9, %v630_v12  ;;  %v1167_v15 = vsel %vm360_vm5, %v1154_v14, %v1166_v5 }
 0x4d0   :  { %v1130_v45 = vpop.permute.xlu1 %1129  ;;  %1311 = vmatmul.mubr.msk.f32.vlgmr.msra.gmra.mrb[0].mxu1 %vm367_vm8, %v631_v16  ;;  %633 = vst.msk [vmem:[#allocation9] sm:$0xff] %vm367_vm8, %v631_v16  ;;  %v1127_v10 = vpop.permute.xlu0 %1126 }
 0x4d1   :  { %v1162_v21 = vrot.slane %v1130_v45, %v1666_v39  ;;  %v1158_v22 = vrot.slane %v1127_v10, %v1666_v39  ;;  %1314 = vmatpush3.msra.mxu1 %v1556_v8  ;;  %1315 = vmatprep.mubr.msk.f32.mxu1 %vm1481_vm9, %v1480_v41 }
 0x4d3   :  { %v1168_v36 = vsel %vm362_vm6, %v1158_v22, %v1167_v15 }
 0x4d4   :  { %v1169_v19 = vsel %vm364_vm7, %v1162_v21, %v1168_v36 }
 0x4d5   :  { %1316 = vmatmul.mubr.msk.f32.vlgmr.msra.gmra.mrb[2].mxu1 %vm367_vm8, %v1169_v19  ;;  %1172 = vst.msk [vmem:[#allocation9 + $0x8] sm:$0xff] %vm367_vm8, %v1169_v19 }
 0x4d6   :  { %1432 = shalt.err (!%p1429_p6)
}
 0x4d7   :  { %s1433_s7 = scalar_lea.hbm %s1999_s6, 256 }
 0x4d8   :  { %p1434_p7 = scmp.ne.s32.totalorder %s1999_s6, %s1433_s7  ;;  %p1437_p8 = scmp.lt.u32.totalorder %s1433_s7, %s1999_s6 }
 0x4da   :  { %p1439_p9 = pnand %p1437_p8, %p1434_p7 }
 0x4dc   :  { %1442 = shalt.err (!%p1439_p9)
}
 0x4dd   :  { %1270 = dma.vmem_to_hbm [thread:$0]  %s1265_s27, 256, %s1999_s6, [#allocation10], %s1474_s8, %s1474_s8, %s1475_s9  }
 0x4de   :  { %s1483_s15 = smov [#allocation8]  }
 0x4df   :  { %s1252_s16 = sshll.u32 %s1483_s15, 4  ;;  %s1253_s16 = int_to_ptr.vmem [resolvable:$true] %s1252_s16 }
 0x4e0   :  { %s1443_s17 = scalar_lea.vmem %s1253_s16, 256  ;;  %p1448_p11 = scmp.lt.s32.totalorder %s1253_s16, %s1253_s16 }
 0x4e1   :  { %p1444_p10 = scmp.ne.s32.totalorder %s1253_s16, %s1443_s17  ;;  %p1449_p12 = scmp.lt.s32.totalorder %s1443_s17, %s1443_s17 }
 0x4e3   :  { %p1450_p13 = por %p1449_p12, %p1448_p11 }
 0x4e5   :  { %p1451_p0 = pnand %p1450_p13, %p1444_p10 }
 0x5a3   :  { %v702_v8 = vpop.f32.mrb[0].mxu1 }
 0x5a4   :  { %706 = vst.msk [vmem:[#allocation8] sm:$0xff] %vm64_vm0, %v702_v8  ;;  %v1312_v39 = vpop.f32.mrb[1].mxu1 }
 0x5a8   :  { %v1241_v32 = vpop.f32.mrb[2].mxu1 }
 0x5a9   :  { %1246 = vst.msk [vmem:[#allocation8 + $0x8] sm:$0xff] %vm64_vm0, %v1241_v32  ;;  %v1317_v18 = vpop.f32.mrb[3].mxu1 }
 0x5aa   :  { %1454 = shalt.err (!%p1451_p0)
}
 0x5ab   :  { %s1455_s19 = scalar_lea.hbm %s1998_s5, 256 }
 0x5ac   :  { %p1456_p1 = scmp.ne.s32.totalorder %s1998_s5, %s1455_s19  ;;  %p1459_p2 = scmp.lt.u32.totalorder %s1455_s19, %s1998_s5 }
 0x5ae   :  { %p1461_p3 = pnand %p1459_p2, %p1456_p1 }
 0x5b0   :  { %1464 = shalt.err (!%p1461_p3)
}
 0x5b1   :  { %1258 = dma.vmem_to_hbm [thread:$0]  %s1253_s16, 256, %s1998_s5, [#allocation5], %s1474_s8, %s1474_s8, %s1475_s9  }
 0x5b2   :  { %1469 = dma.done.wait [#allocation5], 256  }
 0x5b3   :  { %1470 = vsyncadd [#allocation5], 4294967040 }
 0x5b4   :  { %1471 = dma.done.wait [#allocation10], 256  }
 0x5b5   :  { %1472 = vsyncadd [#allocation10], 4294967040 }
 0x5b6   :  { %1277 = vsyncpa [#allocation4], 1 }
 0x5b7   :  { %1278 = vsyncpa [#allocation7], 1 }
 0x5b8   :  { %1279 = vsyncpa [#allocation5], 1 }
 0x5b9   :  { %1280 = vsyncpa [#allocation10], 1 }

</bundles_post_ra>
